<compile_context>
chip_gen: v6e
topology: v6e:2x2x1
jax: 0.10.0
libtpu: 0.0.40
codegen_flags: <defaults>
</compile_context>

<pallas_src>
import jax
import jax.numpy as jnp
from jax import lax
from jax.experimental import pallas as pl
from jax.experimental.pallas import tpu as pltpu

EPS = 1e-15  # matches torch_geometric dense_mincut_pool (no-op in fp32, kept for fidelity)


def _round_up(v, m):
    return ((v + m - 1) // m) * m


def _packed_layout(N, K, H):
    """Row-stacked packing of all outputs into one (rows, cols) slab per graph.

    Every section starts at column 0 and at a sublane-aligned row offset, so
    in-kernel stores need no lane rotation.
    """
    r_xls = 0                           # log_softmax(pooled x): rows [0, K),       cols [0, H)
    r_adj = _round_up(r_xls + K, 8)     # pooled adj:            rows [r_adj, +K),  cols [0, K)
    r_s = _round_up(r_adj + K, 8)       # raw logits s:          rows [r_s, +N),    cols [0, K)
    r_loss = _round_up(r_s + N, 8)      # (mincut, ortho):       row r_loss,        cols [0, 2)
    rows = _round_up(r_loss + 1, 8)
    cols = _round_up(max(H, K, 2), 128)
    return r_xls, r_adj, r_s, r_loss, rows, cols


def _net_kernel(x_ref, adj_ref, wrel_ref, brel_ref, wroot_ref, wpool_ref, bpool_ref,
                out_ref):
    f32 = jnp.float32
    B, N, _ = adj_ref.shape
    H = wrel_ref.shape[1]
    K = wpool_ref.shape[1]
    r_xls, r_adj, r_s, r_loss, _, _ = _packed_layout(N, K, H)

    x_flat = x_ref[...]          # (B*N, C)
    wrel = wrel_ref[...]         # (C, H)
    brel = brel_ref[...]         # (1, H)
    wroot = wroot_ref[...]       # (C, H)
    wpool = wpool_ref[...]       # (H, K)
    bpool = bpool_ref[...]       # (1, K)

    # Deterministic padding in the packed slab.
    out_ref[...] = jnp.zeros_like(out_ref)

    # ---- per-graph neighbourhood aggregation: A_b @ X_b ----
    adj_list = []
    agg_list = []
    for b in range(B):
        adj_b = adj_ref[b]                                           # (N, N)
        adj_list.append(adj_b)
        x_b = x_flat[b * N:(b + 1) * N, :]                           # (N, C)
        agg_list.append(jnp.dot(adj_b, x_b, preferred_element_type=f32))
    agg_flat = jnp.concatenate(agg_list, axis=0)                     # (B*N, C)

    # ---- DenseGraphConv (aggr='add') + ReLU, batched over all graphs ----
    h_flat = (jnp.dot(agg_flat, wrel, preferred_element_type=f32) + brel
              + jnp.dot(x_flat, wroot, preferred_element_type=f32))  # (B*N, H)
    h_flat = jnp.maximum(h_flat, 0.0)

    # ---- pool1: Linear(H, K) -> raw assignment logits (returned as-is) ----
    s_logits = jnp.dot(h_flat, wpool, preferred_element_type=f32) + bpool   # (B*N, K)

    # softmax over clusters (used inside dense_mincut_pool)
    m = jnp.max(s_logits, axis=-1, keepdims=True)
    e = jnp.exp(s_logits - m)
    s_soft = e / jnp.sum(e, axis=-1, keepdims=True)                  # (B*N, K)

    # ---- loop-invariant constants (hoisted: broadcast_in_dim is not CSE'd) ----
    eye_k = (lax.broadcasted_iota(jnp.int32, (K, K), 0)
             == lax.broadcasted_iota(jnp.int32, (K, K), 1)).astype(f32)
    one_minus_eye = 1.0 - eye_k
    i_norm = eye_k * (1.0 / (float(K) ** 0.5))       # I / ||I||_F
    dn_t = (((0,), (0,)), ((), ()))                  # contract axis 0 of both (S^T @ .)
    col01 = lax.broadcasted_iota(jnp.int32, (1, 2), 1)

    # ---- dense_mincut_pool, per graph (static loop, B is tiny) ----
    for b in range(B):
        adj_b = adj_list[b]                                          # (N, N)
        h_b = h_flat[b * N:(b + 1) * N, :]                           # (N, H)
        s_b = s_soft[b * N:(b + 1) * N, :]                           # (N, K)

        out_b = lax.dot_general(s_b, h_b, dn_t,
                                preferred_element_type=f32)          # (K, H) = S^T H
        sta = lax.dot_general(s_b, adj_b, dn_t,
                              preferred_element_type=f32)            # (K, N) = S^T A
        out_adj = jnp.dot(sta, s_b, preferred_element_type=f32)      # (K, K) = S^T A S

        # MinCut loss: -trace(S^T A S) / trace(S^T D S),
        # with trace(S^T D S) = sum_i deg_i * sum_k S_ik^2  (no (N,N) diag matmul).
        mincut_num = jnp.sum(out_adj * eye_k)
        deg = jnp.sum(adj_b, axis=-1, keepdims=True)                 # (N, 1)
        mincut_den = jnp.sum(deg * jnp.sum(s_b * s_b, axis=-1, keepdims=True))
        mincut_loss = -(mincut_num / mincut_den)

        # Orthogonality loss: || SS/||SS||_F - I/||I||_F ||_F
        ss = lax.dot_general(s_b, s_b, dn_t, preferred_element_type=f32)   # (K, K)
        ss_fro = jnp.sqrt(jnp.sum(ss * ss))
        diff = ss / ss_fro - i_norm
        ortho_loss = jnp.sqrt(jnp.sum(diff * diff))

        # Zero diagonal, then symmetric sqrt-degree normalisation.
        out_adj = out_adj * one_minus_eye
        dvec = jnp.sqrt(jnp.sum(out_adj, axis=-1, keepdims=True)) + EPS    # (K, 1)
        out_adj = (out_adj / dvec) / dvec.T

        # log_softmax over the pooled feature dim.
        mo = jnp.max(out_b, axis=-1, keepdims=True)
        zo = out_b - mo
        x_ls = zo - jnp.log(jnp.sum(jnp.exp(zo), axis=-1, keepdims=True))  # (K, H)

        # ---- pack everything into the per-graph slab (one writeback DMA) ----
        out_ref[b, r_xls:r_xls + K, 0:H] = x_ls
        out_ref[b, r_adj:r_adj + K, 0:K] = out_adj
        out_ref[b, r_s:r_s + N, 0:K] = s_logits[b * N:(b + 1) * N, :]
        out_ref[b, r_loss:r_loss + 1, 0:2] = jnp.where(col01 == 0, mincut_loss, ortho_loss)


def net_forward(x, adj, params):
    """Pallas implementation of Net.forward (mask=None path)."""
    # TODO(synk): optional `mask` argument of DenseGraphConv / dense_mincut_pool
    # is not implemented (the module is exercised with mask=None).
    B, N, C = x.shape
    H = params["w_rel"].shape[1]
    K = params["w_pool"].shape[1]
    r_xls, r_adj, r_s, r_loss, rows, cols = _packed_layout(N, K, H)

    x_flat = x.reshape(B * N, C)   # free reshape outside the kernel

    packed = pl.pallas_call(
        _net_kernel,
        out_shape=jax.ShapeDtypeStruct((B, rows, cols), jnp.float32),
        in_specs=[pl.BlockSpec(memory_space=pltpu.MemorySpace.VMEM)] * 7,
        out_specs=pl.BlockSpec(memory_space=pltpu.MemorySpace.VMEM),
    )(x_flat, adj, params["w_rel"], params["b_rel"], params["w_root"],
      params["w_pool"], params["b_pool"])

    x_ls = packed[:, r_xls:r_xls + K, 0:H]           # (B, K, H)
    adj_out = packed[:, r_adj:r_adj + K, 0:K]        # (B, K, K)
    s_raw = packed[:, r_s:r_s + N, 0:K]              # (B, N, K)
    mc1 = jnp.mean(packed[:, r_loss, 0])             # torch.mean over batch
    o1 = jnp.mean(packed[:, r_loss, 1])
    return x_ls, mc1, o1, s_raw, adj_out


def init_params(key, in_channels, hidden_channels, num_tcn):
    """Deterministic synthetic parameters (stored as (in, out) — equivalent to
    torch's x @ W.T + b with W of shape (out, in))."""
    k0, k1, k2, k3, k4 = jax.random.split(key, 5)
    return {
        "w_rel": jax.random.normal(k0, (in_channels, hidden_channels), jnp.float32)
                 / jnp.sqrt(in_channels).astype(jnp.float32),
        "b_rel": 0.01 * jax.random.normal(k1, (1, hidden_channels), jnp.float32),
        "w_root": jax.random.normal(k2, (in_channels, hidden_channels), jnp.float32)
                  / jnp.sqrt(in_channels).astype(jnp.float32),
        "w_pool": jax.random.normal(k3, (hidden_channels, num_tcn), jnp.float32)
                  / jnp.sqrt(hidden_channels).astype(jnp.float32),
        "b_pool": 0.01 * jax.random.normal(k4, (1, num_tcn), jnp.float32),
    }


if __name__ == "__main__":
    B, N, C = 2, 16, 4        # batch, nodes, in_channels
    H, K = 32, 8              # hidden_channels, num_tcn (clusters)

    key = jax.random.PRNGKey(0)
    kx, ka, kp = jax.random.split(key, 3)

    x = jax.random.normal(kx, (B, N, C), jnp.float32)
    adj_raw = jax.random.uniform(ka, (B, N, N), jnp.float32)
    adj = 0.5 * (adj_raw + jnp.transpose(adj_raw, (0, 2, 1)))   # symmetric, positive

    params = init_params(kp, C, H, K)

    outs = net_forward(x, adj, params)
    outs = jax.block_until_ready(outs)

    x_ls, mc1, o1, s_raw, adj_pool = outs
    assert x_ls.shape == (B, K, H)
    assert adj_pool.shape == (B, K, K)
    assert s_raw.shape == (B, N, K)
    assert mc1.shape == () and o1.shape == ()
    assert bool(jnp.all(jnp.isfinite(x_ls)))
    assert bool(jnp.isfinite(mc1)) and bool(jnp.isfinite(o1))

    print("KERNEL_OK")
</pallas_src>

<mosaic_0001>
module attributes {stable_mosaic.version = 11 : i64} {
  func.func @_net_kernel(%arg0: memref<32x4xf32, #tpu.memory_space<vmem>>, %arg1: memref<2x16x16xf32, #tpu.memory_space<vmem>>, %arg2: memref<4x32xf32, #tpu.memory_space<vmem>>, %arg3: memref<1x32xf32, #tpu.memory_space<vmem>>, %arg4: memref<4x32xf32, #tpu.memory_space<vmem>>, %arg5: memref<32x8xf32, #tpu.memory_space<vmem>>, %arg6: memref<1x8xf32, #tpu.memory_space<vmem>>, %arg7: memref<2x40x128xf32, #tpu.memory_space<vmem>>) attributes {dimension_semantics = [], scalar_prefetch = 0 : i64, scratch_operands = 0 : i64, tpu.core_type = #tpu.core_type<tc>} {
    %c0 = arith.constant 0 : index
    %c0_0 = arith.constant 0 : index
    %0 = vector.load %arg0[%c0, %c0_0] : memref<32x4xf32, #tpu.memory_space<vmem>>, vector<32x4xf32>
    %c0_1 = arith.constant 0 : index
    %c0_2 = arith.constant 0 : index
    %1 = vector.load %arg2[%c0_1, %c0_2] : memref<4x32xf32, #tpu.memory_space<vmem>>, vector<4x32xf32>
    %c0_3 = arith.constant 0 : index
    %c0_4 = arith.constant 0 : index
    %2 = vector.load %arg3[%c0_3, %c0_4] : memref<1x32xf32, #tpu.memory_space<vmem>>, vector<1x32xf32>
    %c0_5 = arith.constant 0 : index
    %c0_6 = arith.constant 0 : index
    %3 = vector.load %arg4[%c0_5, %c0_6] : memref<4x32xf32, #tpu.memory_space<vmem>>, vector<4x32xf32>
    %c0_7 = arith.constant 0 : index
    %c0_8 = arith.constant 0 : index
    %4 = vector.load %arg5[%c0_7, %c0_8] : memref<32x8xf32, #tpu.memory_space<vmem>>, vector<32x8xf32>
    %c0_9 = arith.constant 0 : index
    %c0_10 = arith.constant 0 : index
    %5 = vector.load %arg6[%c0_9, %c0_10] : memref<1x8xf32, #tpu.memory_space<vmem>>, vector<1x8xf32>
    %cst = arith.constant 0.000000e+00 : f32
    %6 = vector.broadcast %cst : f32 to vector<2x40x128xf32>
    %c0_11 = arith.constant 0 : index
    %c0_12 = arith.constant 0 : index
    %c0_13 = arith.constant 0 : index
    %7 = vector.load %arg7[%c0_11, %c0_12, %c0_13] : memref<2x40x128xf32, #tpu.memory_space<vmem>>, vector<2x40x128xf32>
    tpu.vector_store %arg7[%c0_11, %c0_12, %c0_13], %6 {strides = array<i32>} : memref<2x40x128xf32, #tpu.memory_space<vmem>>, vector<2x40x128xf32>,
    %c0_14 = arith.constant 0 : index
    %c0_15 = arith.constant 0 : index
    %c0_16 = arith.constant 0 : index
    %8 = vector.load %arg1[%c0_14, %c0_15, %c0_16] : memref<2x16x16xf32, #tpu.memory_space<vmem>>, vector<1x16x16xf32>
    %9 = vector.shape_cast %8 : vector<1x16x16xf32> to vector<16x16xf32>
    %10 = vector.extract_strided_slice %0 {offsets = [0, 0], sizes = [16, 4], strides = [1, 1]} : vector<32x4xf32> to vector<16x4xf32>
    %cst_17 = arith.constant dense<0.000000e+00> : vector<16x4xf32>
    %11 = tpu.matmul %9, %10, %cst_17 {dimension_numbers = #tpu.dot_dimension_numbers<[1], [0], [0], [1], [0, 0, 1, 1], [], []>} : vector<16x16xf32>, vector<16x4xf32>, vector<16x4xf32> -> vector<16x4xf32>
    %c1 = arith.constant 1 : index
    %c0_18 = arith.constant 0 : index
    %c0_19 = arith.constant 0 : index
    %12 = vector.load %arg1[%c1, %c0_18, %c0_19] : memref<2x16x16xf32, #tpu.memory_space<vmem>>, vector<1x16x16xf32>
    %13 = vector.shape_cast %12 : vector<1x16x16xf32> to vector<16x16xf32>
    %14 = vector.extract_strided_slice %0 {offsets = [16, 0], sizes = [16, 4], strides = [1, 1]} : vector<32x4xf32> to vector<16x4xf32>
    %cst_20 = arith.constant dense<0.000000e+00> : vector<16x4xf32>
    %15 = tpu.matmul %13, %14, %cst_20 {dimension_numbers = #tpu.dot_dimension_numbers<[1], [0], [0], [1], [0, 0, 1, 1], [], []>} : vector<16x16xf32>, vector<16x4xf32>, vector<16x4xf32> -> vector<16x4xf32>
    %16 = tpu.concatenate %11, %15 in 0 : vector<16x4xf32>, vector<16x4xf32> -> vector<32x4xf32>
    %cst_21 = arith.constant dense<0.000000e+00> : vector<32x32xf32>
    %17 = tpu.matmul %16, %1, %cst_21 {dimension_numbers = #tpu.dot_dimension_numbers<[1], [0], [0], [1], [0, 0, 1, 1], [], []>} : vector<32x4xf32>, vector<4x32xf32>, vector<32x32xf32> -> vector<32x32xf32>
    %18 = vector.broadcast %2 : vector<1x32xf32> to vector<32x32xf32>
    %19 = arith.addf %17, %18 : vector<32x32xf32>
    %cst_22 = arith.constant dense<0.000000e+00> : vector<32x32xf32>
    %20 = tpu.matmul %0, %3, %cst_22 {dimension_numbers = #tpu.dot_dimension_numbers<[1], [0], [0], [1], [0, 0, 1, 1], [], []>} : vector<32x4xf32>, vector<4x32xf32>, vector<32x32xf32> -> vector<32x32xf32>
    %21 = arith.addf %19, %20 : vector<32x32xf32>
    %cst_23 = arith.constant 0.000000e+00 : f32
    %22 = vector.broadcast %cst_23 : f32 to vector<32x32xf32>
    %23 = arith.maximumf %21, %22 : vector<32x32xf32>
    %cst_24 = arith.constant dense<0.000000e+00> : vector<32x8xf32>
    %24 = tpu.matmul %23, %4, %cst_24 {dimension_numbers = #tpu.dot_dimension_numbers<[1], [0], [0], [1], [0, 0, 1, 1], [], []>} : vector<32x32xf32>, vector<32x8xf32>, vector<32x8xf32> -> vector<32x8xf32>
    %25 = vector.broadcast %5 : vector<1x8xf32> to vector<32x8xf32>
    %26 = arith.addf %24, %25 : vector<32x8xf32>
    %cst_25 = arith.constant dense<0xFF800000> : vector<32xf32>
    %27 = vector.multi_reduction <maximumf>, %26, %cst_25 [1] : vector<32x8xf32> to vector<32xf32>
    %28 = vector.shape_cast %27 : vector<32xf32> to vector<32x1xf32>
    %29 = vector.broadcast %28 : vector<32x1xf32> to vector<32x8xf32>
    %30 = arith.subf %26, %29 : vector<32x8xf32>
    %31 = math.exp %30 : vector<32x8xf32>
    %cst_26 = arith.constant dense<0.000000e+00> : vector<32xf32>
    %32 = vector.multi_reduction <add>, %31, %cst_26 [1] : vector<32x8xf32> to vector<32xf32>
    %33 = vector.shape_cast %32 : vector<32xf32> to vector<32x1xf32>
    %34 = vector.broadcast %33 : vector<32x1xf32> to vector<32x8xf32>
    %35 = arith.divf %31, %34 : vector<32x8xf32>
    %36 = tpu.iota {dimensions = array<i32: 0>} : vector<8x8xi32>
    %37 = tpu.iota {dimensions = array<i32: 1>} : vector<8x8xi32>
    %38 = arith.cmpi eq, %36, %37 : vector<8x8xi32>
    %39 = arith.extui %38 : vector<8x8xi1> to vector<8x8xi32>
    %40 = arith.sitofp %39 : vector<8x8xi32> to vector<8x8xf32>
    %cst_27 = arith.constant 1.000000e+00 : f32
    %41 = vector.broadcast %cst_27 : f32 to vector<8x8xf32>
    %42 = arith.subf %41, %40 : vector<8x8xf32>
    %cst_28 = arith.constant 0.353553385 : f32
    %43 = vector.broadcast %cst_28 : f32 to vector<8x8xf32>
    %44 = arith.mulf %40, %43 : vector<8x8xf32>
    %45 = tpu.iota {dimensions = array<i32: 1>} : vector<1x2xi32>
    %46 = vector.extract_strided_slice %23 {offsets = [0, 0], sizes = [16, 32], strides = [1, 1]} : vector<32x32xf32> to vector<16x32xf32>
    %47 = vector.extract_strided_slice %35 {offsets = [0, 0], sizes = [16, 8], strides = [1, 1]} : vector<32x8xf32> to vector<16x8xf32>
    %cst_29 = arith.constant dense<0.000000e+00> : vector<8x32xf32>
    %48 = tpu.matmul %47, %46, %cst_29 {dimension_numbers = #tpu.dot_dimension_numbers<[0], [0], [1], [1], [0, 1, 1, 1], [], []>} : vector<16x8xf32>, vector<16x32xf32>, vector<8x32xf32> -> vector<8x32xf32>
    %cst_30 = arith.constant dense<0.000000e+00> : vector<8x16xf32>
    %49 = tpu.matmul %47, %9, %cst_30 {dimension_numbers = #tpu.dot_dimension_numbers<[0], [0], [1], [1], [0, 1, 1, 1], [], []>} : vector<16x8xf32>, vector<16x16xf32>, vector<8x16xf32> -> vector<8x16xf32>
    %cst_31 = arith.constant dense<0.000000e+00> : vector<8x8xf32>
    %50 = tpu.matmul %49, %47, %cst_31 {dimension_numbers = #tpu.dot_dimension_numbers<[1], [0], [0], [1], [0, 0, 1, 1], [], []>} : vector<8x16xf32>, vector<16x8xf32>, vector<8x8xf32> -> vector<8x8xf32>
    %51 = arith.mulf %50, %40 : vector<8x8xf32>
    %52 = vector.shape_cast %51 : vector<8x8xf32> to vector<1x8x8xf32>
    %cst_32 = arith.constant dense<0.000000e+00> : vector<1xf32>
    %53 = vector.multi_reduction <add>, %52, %cst_32 [1, 2] : vector<1x8x8xf32> to vector<1xf32>
    %54 = vector.shape_cast %53 : vector<1xf32> to vector<1x1x1xf32>
    %55 = vector.extract %54[0, 0, 0] : f32 from vector<1x1x1xf32>
    %cst_33 = arith.constant dense<0.000000e+00> : vector<16xf32>
    %56 = vector.multi_reduction <add>, %9, %cst_33 [1] : vector<16x16xf32> to vector<16xf32>
    %57 = vector.shape_cast %56 : vector<16xf32> to vector<16x1xf32>
    %58 = arith.mulf %47, %47 : vector<16x8xf32>
    %cst_34 = arith.constant dense<0.000000e+00> : vector<16xf32>
    %59 = vector.multi_reduction <add>, %58, %cst_34 [1] : vector<16x8xf32> to vector<16xf32>
    %60 = vector.shape_cast %59 : vector<16xf32> to vector<16x1xf32>
    %61 = arith.mulf %57, %60 : vector<16x1xf32>
    %62 = vector.shape_cast %61 : vector<16x1xf32> to vector<1x16x1xf32>
    %cst_35 = arith.constant dense<0.000000e+00> : vector<1xf32>
    %63 = vector.multi_reduction <add>, %62, %cst_35 [1, 2] : vector<1x16x1xf32> to vector<1xf32>
    %64 = vector.shape_cast %63 : vector<1xf32> to vector<1x1x1xf32>
    %65 = vector.extract %64[0, 0, 0] : f32 from vector<1x1x1xf32>
    %66 = arith.divf %55, %65 : f32
    %cst_36 = arith.constant 0.000000e+00 : f32
    %67 = arith.subf %cst_36, %66 : f32
    %cst_37 = arith.constant dense<0.000000e+00> : vector<8x8xf32>
    %68 = tpu.matmul %47, %47, %cst_37 {dimension_numbers = #tpu.dot_dimension_numbers<[0], [0], [1], [1], [0, 1, 1, 1], [], []>} : vector<16x8xf32>, vector<16x8xf32>, vector<8x8xf32> -> vector<8x8xf32>
    %69 = arith.mulf %68, %68 : vector<8x8xf32>
    %70 = vector.shape_cast %69 : vector<8x8xf32> to vector<1x8x8xf32>
    %cst_38 = arith.constant dense<0.000000e+00> : vector<1xf32>
    %71 = vector.multi_reduction <add>, %70, %cst_38 [1, 2] : vector<1x8x8xf32> to vector<1xf32>
    %72 = vector.shape_cast %71 : vector<1xf32> to vector<1x1x1xf32>
    %73 = vector.extract %72[0, 0, 0] : f32 from vector<1x1x1xf32>
    %74 = math.sqrt %73 : f32
    %75 = vector.broadcast %74 : f32 to vector<8x8xf32>
    %76 = arith.divf %68, %75 : vector<8x8xf32>
    %77 = arith.subf %76, %44 : vector<8x8xf32>
    %78 = arith.mulf %77, %77 : vector<8x8xf32>
    %79 = vector.shape_cast %78 : vector<8x8xf32> to vector<1x8x8xf32>
    %cst_39 = arith.constant dense<0.000000e+00> : vector<1xf32>
    %80 = vector.multi_reduction <add>, %79, %cst_39 [1, 2] : vector<1x8x8xf32> to vector<1xf32>
    %81 = vector.shape_cast %80 : vector<1xf32> to vector<1x1x1xf32>
    %82 = vector.extract %81[0, 0, 0] : f32 from vector<1x1x1xf32>
    %83 = math.sqrt %82 : f32
    %84 = arith.mulf %50, %42 : vector<8x8xf32>
    %cst_40 = arith.constant dense<0.000000e+00> : vector<8xf32>
    %85 = vector.multi_reduction <add>, %84, %cst_40 [1] : vector<8x8xf32> to vector<8xf32>
    %86 = vector.shape_cast %85 : vector<8xf32> to vector<8x1xf32>
    %87 = math.sqrt %86 : vector<8x1xf32>
    %cst_41 = arith.constant 1.000000e-15 : f32
    %88 = vector.broadcast %cst_41 : f32 to vector<8x1xf32>
    %89 = arith.addf %87, %88 : vector<8x1xf32>
    %90 = vector.broadcast %89 : vector<8x1xf32> to vector<8x8xf32>
    %91 = arith.divf %84, %90 : vector<8x8xf32>
    %92 = tpu.transpose %89, [1, 0] : vector<8x1xf32> -> vector<1x8xf32>
    %93 = vector.broadcast %92 : vector<1x8xf32> to vector<8x8xf32>
    %94 = arith.divf %91, %93 : vector<8x8xf32>
    %cst_42 = arith.constant dense<0xFF800000> : vector<8xf32>
    %95 = vector.multi_reduction <maximumf>, %48, %cst_42 [1] : vector<8x32xf32> to vector<8xf32>
    %96 = vector.shape_cast %95 : vector<8xf32> to vector<8x1xf32>
    %97 = vector.broadcast %96 : vector<8x1xf32> to vector<8x32xf32>
    %98 = arith.subf %48, %97 : vector<8x32xf32>
    %99 = math.exp %98 : vector<8x32xf32>
    %cst_43 = arith.constant dense<0.000000e+00> : vector<8xf32>
    %100 = vector.multi_reduction <add>, %99, %cst_43 [1] : vector<8x32xf32> to vector<8xf32>
    %101 = vector.shape_cast %100 : vector<8xf32> to vector<8x1xf32>
    %102 = math.log %101 : vector<8x1xf32>
    %103 = vector.broadcast %102 : vector<8x1xf32> to vector<8x32xf32>
    %104 = arith.subf %98, %103 : vector<8x32xf32>
    %c0_44 = arith.constant 0 : index
    %c0_45 = arith.constant 0 : index
    %c0_46 = arith.constant 0 : index
    %105 = vector.load %arg7[%c0_44, %c0_45, %c0_46] : memref<2x40x128xf32, #tpu.memory_space<vmem>>, vector<1x8x32xf32>
    %106 = vector.shape_cast %105 : vector<1x8x32xf32> to vector<8x32xf32>
    %107 = vector.shape_cast %104 : vector<8x32xf32> to vector<1x8x32xf32>
    tpu.vector_store %arg7[%c0_44, %c0_45, %c0_46], %107 {strides = array<i32>} : memref<2x40x128xf32, #tpu.memory_space<vmem>>, vector<1x8x32xf32>,
    %c0_47 = arith.constant 0 : index
    %c8 = arith.constant 8 : index
    %c0_48 = arith.constant 0 : index
    %108 = vector.load %arg7[%c0_47, %c8, %c0_48] : memref<2x40x128xf32, #tpu.memory_space<vmem>>, vector<1x8x8xf32>
    %109 = vector.shape_cast %108 : vector<1x8x8xf32> to vector<8x8xf32>
    %110 = vector.shape_cast %94 : vector<8x8xf32> to vector<1x8x8xf32>
    tpu.vector_store %arg7[%c0_47, %c8, %c0_48], %110 {strides = array<i32>} : memref<2x40x128xf32, #tpu.memory_space<vmem>>, vector<1x8x8xf32>,
    %111 = vector.extract_strided_slice %26 {offsets = [0, 0], sizes = [16, 8], strides = [1, 1]} : vector<32x8xf32> to vector<16x8xf32>
    %c0_49 = arith.constant 0 : index
    %c16 = arith.constant 16 : index
    %c0_50 = arith.constant 0 : index
    %112 = vector.load %arg7[%c0_49, %c16, %c0_50] : memref<2x40x128xf32, #tpu.memory_space<vmem>>, vector<1x16x8xf32>
    %113 = vector.shape_cast %112 : vector<1x16x8xf32> to vector<16x8xf32>
    %114 = vector.shape_cast %111 : vector<16x8xf32> to vector<1x16x8xf32>
    tpu.vector_store %arg7[%c0_49, %c16, %c0_50], %114 {strides = array<i32>} : memref<2x40x128xf32, #tpu.memory_space<vmem>>, vector<1x16x8xf32>,
    %c0_i32 = arith.constant 0 : i32
    %115 = vector.broadcast %c0_i32 : i32 to vector<1x2xi32>
    %116 = arith.cmpi eq, %45, %115 : vector<1x2xi32>
    %117 = vector.broadcast %67 : f32 to vector<1x2xf32>
    %118 = vector.broadcast %83 : f32 to vector<1x2xf32>
    %119 = arith.select %116, %117, %118 : vector<1x2xi1>, vector<1x2xf32>
    %c0_51 = arith.constant 0 : index
    %c32 = arith.constant 32 : index
    %c0_52 = arith.constant 0 : index
    %120 = vector.load %arg7[%c0_51, %c32, %c0_52] : memref<2x40x128xf32, #tpu.memory_space<vmem>>, vector<1x1x2xf32>
    %121 = vector.shape_cast %120 : vector<1x1x2xf32> to vector<1x2xf32>
    %122 = vector.shape_cast %119 : vector<1x2xf32> to vector<1x1x2xf32>
    tpu.vector_store %arg7[%c0_51, %c32, %c0_52], %122 {strides = array<i32>} : memref<2x40x128xf32, #tpu.memory_space<vmem>>, vector<1x1x2xf32>,
    %123 = vector.extract_strided_slice %23 {offsets = [16, 0], sizes = [16, 32], strides = [1, 1]} : vector<32x32xf32> to vector<16x32xf32>
    %124 = vector.extract_strided_slice %35 {offsets = [16, 0], sizes = [16, 8], strides = [1, 1]} : vector<32x8xf32> to vector<16x8xf32>
    %cst_53 = arith.constant dense<0.000000e+00> : vector<8x32xf32>
    %125 = tpu.matmul %124, %123, %cst_53 {dimension_numbers = #tpu.dot_dimension_numbers<[0], [0], [1], [1], [0, 1, 1, 1], [], []>} : vector<16x8xf32>, vector<16x32xf32>, vector<8x32xf32> -> vector<8x32xf32>
    %cst_54 = arith.constant dense<0.000000e+00> : vector<8x16xf32>
    %126 = tpu.matmul %124, %13, %cst_54 {dimension_numbers = #tpu.dot_dimension_numbers<[0], [0], [1], [1], [0, 1, 1, 1], [], []>} : vector<16x8xf32>, vector<16x16xf32>, vector<8x16xf32> -> vector<8x16xf32>
    %cst_55 = arith.constant dense<0.000000e+00> : vector<8x8xf32>
    %127 = tpu.matmul %126, %124, %cst_55 {dimension_numbers = #tpu.dot_dimension_numbers<[1], [0], [0], [1], [0, 0, 1, 1], [], []>} : vector<8x16xf32>, vector<16x8xf32>, vector<8x8xf32> -> vector<8x8xf32>
    %128 = arith.mulf %127, %40 : vector<8x8xf32>
    %129 = vector.shape_cast %128 : vector<8x8xf32> to vector<1x8x8xf32>
    %cst_56 = arith.constant dense<0.000000e+00> : vector<1xf32>
    %130 = vector.multi_reduction <add>, %129, %cst_56 [1, 2] : vector<1x8x8xf32> to vector<1xf32>
    %131 = vector.shape_cast %130 : vector<1xf32> to vector<1x1x1xf32>
    %132 = vector.extract %131[0, 0, 0] : f32 from vector<1x1x1xf32>
    %cst_57 = arith.constant dense<0.000000e+00> : vector<16xf32>
    %133 = vector.multi_reduction <add>, %13, %cst_57 [1] : vector<16x16xf32> to vector<16xf32>
    %134 = vector.shape_cast %133 : vector<16xf32> to vector<16x1xf32>
    %135 = arith.mulf %124, %124 : vector<16x8xf32>
    %cst_58 = arith.constant dense<0.000000e+00> : vector<16xf32>
    %136 = vector.multi_reduction <add>, %135, %cst_58 [1] : vector<16x8xf32> to vector<16xf32>
    %137 = vector.shape_cast %136 : vector<16xf32> to vector<16x1xf32>
    %138 = arith.mulf %134, %137 : vector<16x1xf32>
    %139 = vector.shape_cast %138 : vector<16x1xf32> to vector<1x16x1xf32>
    %cst_59 = arith.constant dense<0.000000e+00> : vector<1xf32>
    %140 = vector.multi_reduction <add>, %139, %cst_59 [1, 2] : vector<1x16x1xf32> to vector<1xf32>
    %141 = vector.shape_cast %140 : vector<1xf32> to vector<1x1x1xf32>
    %142 = vector.extract %141[0, 0, 0] : f32 from vector<1x1x1xf32>
    %143 = arith.divf %132, %142 : f32
    %cst_60 = arith.constant 0.000000e+00 : f32
    %144 = arith.subf %cst_60, %143 : f32
    %cst_61 = arith.constant dense<0.000000e+00> : vector<8x8xf32>
    %145 = tpu.matmul %124, %124, %cst_61 {dimension_numbers = #tpu.dot_dimension_numbers<[0], [0], [1], [1], [0, 1, 1, 1], [], []>} : vector<16x8xf32>, vector<16x8xf32>, vector<8x8xf32> -> vector<8x8xf32>
    %146 = arith.mulf %145, %145 : vector<8x8xf32>
    %147 = vector.shape_cast %146 : vector<8x8xf32> to vector<1x8x8xf32>
    %cst_62 = arith.constant dense<0.000000e+00> : vector<1xf32>
    %148 = vector.multi_reduction <add>, %147, %cst_62 [1, 2] : vector<1x8x8xf32> to vector<1xf32>
    %149 = vector.shape_cast %148 : vector<1xf32> to vector<1x1x1xf32>
    %150 = vector.extract %149[0, 0, 0] : f32 from vector<1x1x1xf32>
    %151 = math.sqrt %150 : f32
    %152 = vector.broadcast %151 : f32 to vector<8x8xf32>
    %153 = arith.divf %145, %152 : vector<8x8xf32>
    %154 = arith.subf %153, %44 : vector<8x8xf32>
    %155 = arith.mulf %154, %154 : vector<8x8xf32>
    %156 = vector.shape_cast %155 : vector<8x8xf32> to vector<1x8x8xf32>
    %cst_63 = arith.constant dense<0.000000e+00> : vector<1xf32>
    %157 = vector.multi_reduction <add>, %156, %cst_63 [1, 2] : vector<1x8x8xf32> to vector<1xf32>
    %158 = vector.shape_cast %157 : vector<1xf32> to vector<1x1x1xf32>
    %159 = vector.extract %158[0, 0, 0] : f32 from vector<1x1x1xf32>
    %160 = math.sqrt %159 : f32
    %161 = arith.mulf %127, %42 : vector<8x8xf32>
    %cst_64 = arith.constant dense<0.000000e+00> : vector<8xf32>
    %162 = vector.multi_reduction <add>, %161, %cst_64 [1] : vector<8x8xf32> to vector<8xf32>
    %163 = vector.shape_cast %162 : vector<8xf32> to vector<8x1xf32>
    %164 = math.sqrt %163 : vector<8x1xf32>
    %cst_65 = arith.constant 1.000000e-15 : f32
    %165 = vector.broadcast %cst_65 : f32 to vector<8x1xf32>
    %166 = arith.addf %164, %165 : vector<8x1xf32>
    %167 = vector.broadcast %166 : vector<8x1xf32> to vector<8x8xf32>
    %168 = arith.divf %161, %167 : vector<8x8xf32>
    %169 = tpu.transpose %166, [1, 0] : vector<8x1xf32> -> vector<1x8xf32>
    %170 = vector.broadcast %169 : vector<1x8xf32> to vector<8x8xf32>
    %171 = arith.divf %168, %170 : vector<8x8xf32>
    %cst_66 = arith.constant dense<0xFF800000> : vector<8xf32>
    %172 = vector.multi_reduction <maximumf>, %125, %cst_66 [1] : vector<8x32xf32> to vector<8xf32>
    %173 = vector.shape_cast %172 : vector<8xf32> to vector<8x1xf32>
    %174 = vector.broadcast %173 : vector<8x1xf32> to vector<8x32xf32>
    %175 = arith.subf %125, %174 : vector<8x32xf32>
    %176 = math.exp %175 : vector<8x32xf32>
    %cst_67 = arith.constant dense<0.000000e+00> : vector<8xf32>
    %177 = vector.multi_reduction <add>, %176, %cst_67 [1] : vector<8x32xf32> to vector<8xf32>
    %178 = vector.shape_cast %177 : vector<8xf32> to vector<8x1xf32>
    %179 = math.log %178 : vector<8x1xf32>
    %180 = vector.broadcast %179 : vector<8x1xf32> to vector<8x32xf32>
    %181 = arith.subf %175, %180 : vector<8x32xf32>
    %c1_68 = arith.constant 1 : index
    %c0_69 = arith.constant 0 : index
    %c0_70 = arith.constant 0 : index
    %182 = vector.load %arg7[%c1_68, %c0_69, %c0_70] : memref<2x40x128xf32, #tpu.memory_space<vmem>>, vector<1x8x32xf32>
    %183 = vector.shape_cast %182 : vector<1x8x32xf32> to vector<8x32xf32>
    %184 = vector.shape_cast %181 : vector<8x32xf32> to vector<1x8x32xf32>
    tpu.vector_store %arg7[%c1_68, %c0_69, %c0_70], %184 {strides = array<i32>} : memref<2x40x128xf32, #tpu.memory_space<vmem>>, vector<1x8x32xf32>,
    %c1_71 = arith.constant 1 : index
    %c8_72 = arith.constant 8 : index
    %c0_73 = arith.constant 0 : index
    %185 = vector.load %arg7[%c1_71, %c8_72, %c0_73] : memref<2x40x128xf32, #tpu.memory_space<vmem>>, vector<1x8x8xf32>
    %186 = vector.shape_cast %185 : vector<1x8x8xf32> to vector<8x8xf32>
    %187 = vector.shape_cast %171 : vector<8x8xf32> to vector<1x8x8xf32>
    tpu.vector_store %arg7[%c1_71, %c8_72, %c0_73], %187 {strides = array<i32>} : memref<2x40x128xf32, #tpu.memory_space<vmem>>, vector<1x8x8xf32>,
    %188 = vector.extract_strided_slice %26 {offsets = [16, 0], sizes = [16, 8], strides = [1, 1]} : vector<32x8xf32> to vector<16x8xf32>
    %c1_74 = arith.constant 1 : index
    %c16_75 = arith.constant 16 : index
    %c0_76 = arith.constant 0 : index
    %189 = vector.load %arg7[%c1_74, %c16_75, %c0_76] : memref<2x40x128xf32, #tpu.memory_space<vmem>>, vector<1x16x8xf32>
    %190 = vector.shape_cast %189 : vector<1x16x8xf32> to vector<16x8xf32>
    %191 = vector.shape_cast %188 : vector<16x8xf32> to vector<1x16x8xf32>
    tpu.vector_store %arg7[%c1_74, %c16_75, %c0_76], %191 {strides = array<i32>} : memref<2x40x128xf32, #tpu.memory_space<vmem>>, vector<1x16x8xf32>,
    %c0_i32_77 = arith.constant 0 : i32
    %192 = vector.broadcast %c0_i32_77 : i32 to vector<1x2xi32>
    %193 = arith.cmpi eq, %45, %192 : vector<1x2xi32>
    %194 = vector.broadcast %144 : f32 to vector<1x2xf32>
    %195 = vector.broadcast %160 : f32 to vector<1x2xf32>
    %196 = arith.select %193, %194, %195 : vector<1x2xi1>, vector<1x2xf32>
    %c1_78 = arith.constant 1 : index
    %c32_79 = arith.constant 32 : index
    %c0_80 = arith.constant 0 : index
    %197 = vector.load %arg7[%c1_78, %c32_79, %c0_80] : memref<2x40x128xf32, #tpu.memory_space<vmem>>, vector<1x1x2xf32>
    %198 = vector.shape_cast %197 : vector<1x1x2xf32> to vector<1x2xf32>
    %199 = vector.shape_cast %196 : vector<1x2xf32> to vector<1x1x2xf32>
    tpu.vector_store %arg7[%c1_78, %c32_79, %c0_80], %199 {strides = array<i32>} : memref<2x40x128xf32, #tpu.memory_space<vmem>>, vector<1x1x2xf32>,
    return
  }
}

</mosaic_0001>

<bundles_post_ra>
// kernel: tpu_custom_call.1
= control target key start
LH: loop header
LB: loop body
LE: loop exit
PB: predicated region body
PF: predicated region fallthrough
CT: control target
= control target key end

     0   :  { %vm51_vm0 = vcmask 130048   ;;  %vm236_vm1 = vcmask 1043456   ;;  %s2165_s0 = inlined_call_operand.vmem [shape: f32[32,4], index: 0, kind: input, shape index: {}]   ;;  %s2166_s1 = inlined_call_operand.vmem [shape: f32[2,16,16], index: 1, kind: input, shape index: {}]   ;;  %s2167_s2 = inlined_call_operand.vmem [shape: f32[4,32], index: 2, kind: input, shape index: {}]   ;;  %s2168_s3 = inlined_call_operand.vmem [shape: f32[1,32], index: 3, kind: input, shape index: {}]   ;;  %s2169_s4 = inlined_call_operand.vmem [shape: f32[4,32], index: 4, kind: input, shape index: {}]   ;;  %s2170_s5 = inlined_call_operand.vmem [shape: f32[32,8], index: 5, kind: input, shape index: {}]   ;;  %s2171_s6 = inlined_call_operand.vmem [shape: f32[1,8], index: 6, kind: input, shape index: {}]   ;;  %s2172_s7 = inlined_call_operand.hbm [shape: f32[2,40,128], index: 7, kind: output, shape index: {}]  }
   0x1   :  { %v28_v0 = vld [vmem:[%s2165_s0 + $0x8] sm:$0xff]  ;;  %v27_v1 = vld [vmem:[%s2165_s0] sm:$0xff]  ;;  %v30_v3 = vld [vmem:[%s2165_s0 + $0x18] sm:$0xff] }
   0x2   :  { %v1909_v2 = vld [vmem:[%s2166_s1] sm:$0xff]  ;;  %1648 = vmatprep.subr.mxu0 %v28_v0  ;;  %v29_v4 = vld [vmem:[%s2165_s0 + $0x10] sm:$0xff]  ;;  %v1922_v5 = vld [vmem:[%s2166_s1 + $0x8] sm:$0xff]  ;;  %1655 = vmatprep.subr.mxu1 %v30_v3 }
   0x3   :  { %1652 = vmatprep.mubr.msk.f32.mxu0 %vm51_vm0, %v1909_v2  ;;  %1649 = vmatpush3.msra.mxu0 %v28_v0  ;;  %v1927_v6 = vld [vmem:[%s2166_s1 + $0x10] sm:$0xff]  ;;  %v31_v7 = vld [vmem:[%s2167_s2] sm:$0xf] }
   0x4   :  { %1650 = vmatprep.subr.mxu0 %v27_v1  ;;  %1656 = vmatpush3.msra.mxu1 %v30_v3 }
   0x5   :  { %12 = vsyncpa [#allocation3], 0  ;;  %1651 = vmatpush3.msra.mxu0 %v27_v1  ;;  %1657 = vmatprep.subr.mxu1 %v29_v4  ;;  %v1935_v8 = vld [vmem:[%s2166_s1 + $0x18] sm:$0xff]  ;;  %v33_v9 = vld [vmem:[%s2169_s4] sm:$0xf]  ;;  %vm223_vm2 = vcmask 31744  }
   0x6   :  { %1653 = vmatmul.mubr.msk.f32.vlgmr.msra.gmra.mxu0 %vm51_vm0, %v1922_v5  ;;  %1658 = vmatpush3.msra.mxu1 %v29_v4  ;;  %v37_v14 = vld [vmem:[%s2170_s5 + $0x18] sm:$0xff]  ;;  %v36_v15 = vld [vmem:[%s2170_s5 + $0x10] sm:$0xff]  ;;  %v35_v16 = vld [vmem:[%s2170_s5 + $0x8] sm:$0xff]  ;;  %v1855_v17 = vmov 0.0   ;;  %vm439_vm3 = vcmask 261120   ;;  %vm537_vm4 = vcmask 64512  }
   0x7   :  { %1659 = vmatprep.mubr.msk.f32.mxu1 %vm51_vm0, %v1927_v6  ;;  %1662 = vmatprep.subr.msk.mxu0 %vm236_vm1, %v31_v7  ;;  %39 = vst [vmem:[#allocation2] sm:$0xff] %v1855_v17  ;;  %40 = vst [vmem:[#allocation2 + $0x8] sm:$0xff] %v1855_v17  ;;  %v34_v18 = vld [vmem:[%s2170_s5] sm:$0xff]  ;;  %vm1856_vm5 = vmmov 0   ;;  %vm866_vm6 = vcmask 7168   ;;  %vm1070_vm15 = vcmask 8192  }
   0x8   :  { %1660 = vmatmul.mubr.msk.f32.vlgmr.msra.gmra.mxu1 %vm51_vm0, %v1935_v8  ;;  %1663 = vmatpush3.msk.msra.mxu0 %vm236_vm1, %v31_v7  ;;  %41 = vst [vmem:[#allocation2 + $0x10] sm:$0xff] %v1855_v17  ;;  %42 = vst [vmem:[#allocation2 + $0x18] sm:$0xff] %v1855_v17  ;;  %v1573_v20 = vld [vmem:[%s2168_s3] ss:$0 sm:$0xff]  ;;  %s1857_s1 = smov [#allocation2]  }
   0x9   :  { %1670 = vmatprep.subr.msk.mxu1 %vm236_vm1, %v33_v9  ;;  %1672 = vmatprep.mubr.msk.f32.mxu1 %vm223_vm2, %v27_v1  ;;  %43 = vst [vmem:[#allocation2 + $0x20] sm:$0xff] %v1855_v17  ;;  %44 = vst [vmem:[#allocation2 + $0x28] sm:$0xff] %v1855_v17  ;;  %v1584_v40 = vld [vmem:[%s2171_s6] ss:$0 sm:$0xff]  ;;  %s1556_s19 = sshll.u32 %s1857_s1, 4  ;;  %s1557_s19 = int_to_ptr.vmem [resolvable:$true] %s1556_s19 }
   0xa   :  { %1671 = vmatpush3.msk.msra.mxu1 %vm236_vm1, %v33_v9  ;;  %1678 = vmatprep.subr.mxu0 %v37_v14  ;;  %45 = vst [vmem:[#allocation2 + $0x30] sm:$0xff] %v1855_v17  ;;  %46 = vst [vmem:[#allocation2 + $0x38] sm:$0xff] %v1855_v17  ;;  %s1833_s4 = scalar_lea.vmem %s1557_s19, 1280  ;;  %p1838_p1 = scmp.lt.s32.totalorder %s1557_s19, %s1557_s19 }
   0xb   :  { %1692 = vmatprep.subr.mxu1 %v1855_v17  ;;  %47 = vst [vmem:[#allocation2 + $0x40] sm:$0xff] %v1855_v17  ;;  %48 = vst [vmem:[#allocation2 + $0x48] sm:$0xff] %v1855_v17  ;;  %p1834_p0 = scmp.ne.s32.totalorder %s1557_s19, %s1833_s4  ;;  %p1839_p2 = scmp.lt.s32.totalorder %s1833_s4, %s1833_s4 }
   0xc   :  { %1673 = vmatmul.mubr.msk.f32.vlgmr.msra.gmra.mxu1 %vm223_vm2, %v28_v0 }
   0xd   :  { %1675 = vmatprep.mubr.msk.f32.mxu1 %vm223_vm2, %v29_v4  ;;  %p1840_p3 = por %p1839_p2, %p1838_p1 }
   0xf   :  { %p1841_p4 = pnand %p1840_p3, %p1834_p0 }
  0x10   :  { %1676 = vmatmul.mubr.msk.f32.gmra.mxu1 %vm223_vm2, %v30_v3 }
  0x11   :  { %1696 = vmatprep.mubr.msk.f32.mxu1 %vm1856_vm5, %v1855_v17 }
  0xc6   :  { %v1654_v10 = vpop.f32.mrf.mxu0 }
  0xc8   :  { %v124_v11 = vpop.f32.mrf.mxu0  ;;  %v1661_v12 = vpop.f32.mrf.mxu1 }
  0xc9   :  { %1664 = vmatprep.mubr.msk.f32.mxu0 %vm223_vm2, %v124_v11 }
  0xca   :  { %1665 = vmatmul.mubr.msk.f32.vlgmr.msra.gmra.mxu0 %vm223_vm2, %v1654_v10  ;;  %v208_v13 = vpop.f32.mrf.mxu1 }
  0xcb   :  { %1667 = vmatprep.mubr.msk.f32.mxu0 %vm223_vm2, %v208_v13  ;;  %1679 = vmatpush3.msra.mxu0 %v37_v14 }
  0xcc   :  { %1680 = vmatprep.subr.mxu0 %v36_v15  ;;  %v1674_v19 = vpop.f32.mrf.mxu1 }
  0xcd   :  { %1681 = vmatpush3.msra.mxu0 %v36_v15 }
  0xce   :  { %1668 = vmatmul.mubr.msk.f32.gmra.mxu0 %vm223_vm2, %v1661_v12  ;;  %1682 = vmatprep.subr.mxu0 %v35_v16  ;;  %v406_v22 = vpop.f32.mrf.mxu1 }
  0xcf   :  { %1683 = vmatpush3.msra.mxu0 %v35_v16 }
  0xd0   :  { %1684 = vmatprep.subr.mxu0 %v34_v18  ;;  %v1677_v25 = vpop.f32.mrf.mxu1 }
  0xd1   :  { %1685 = vmatpush3.msra.mxu0 %v34_v18 }
  0xd2   :  { %1706 = vmatprep.subr.mxu0 %v1855_v17  ;;  %v416_v33 = vpop.f32.mrf.mxu1 }
 0x18a   :  { %v1666_v21 = vpop.f32.mrf.mxu0 }
 0x18b   :  { %v312_v23 = vadd.f32 %v1666_v21, %v1573_v20  ;;  %v853_v21 = vsel %vm51_vm0, %v1922_v5, 0.0 }
 0x18c   :  { %v306_v24 = vpop.f32.mrf.mxu0 }
 0x18d   :  { %v426_v26 = vadd.f32 %v1674_v19, %v312_v23  ;;  %v307_v27 = vadd.f32 %v1573_v20, %v306_v24 }
 0x18e   :  { %v1669_v28 = vpop.f32.mrf.mxu0 }
 0x18f   :  { %v430_v29 = vmax.f32 %v426_v26, 0.0  ;;  %v425_v30 = vadd.f32 %v406_v22, %v307_v27  ;;  %v322_v31 = vadd.f32 %v1669_v28, %v1573_v20 }
 0x190   :  { %v316_v32 = vpop.f32.mrf.mxu0 }
 0x191   :  { %v429_v34 = vmax.f32 %v425_v30, 0.0  ;;  %1693 = vmatpush3.msra.mxu1 %v430_v29  ;;  %v317_v35 = vadd.f32 %v1573_v20, %v316_v32  ;;  %v1973_v36 = vadd.f32 %v1677_v25, %v322_v31  ;;  %v850_v20 = vsel %vm51_vm0, %v1909_v2, 0.0 }
 0x192   :  { %1694 = vmatprep.subr.mxu1 %v1855_v17 }
 0x193   :  { %1686 = vmatprep.mubr.msk.f32.mxu0 %vm439_vm3, %v429_v34  ;;  %1695 = vmatpush3.msra.mxu1 %v429_v34  ;;  %v1977_v37 = vadd.f32 %v416_v33, %v317_v35  ;;  %v432_v38 = vmax.f32 %v1973_v36, 0.0  ;;  %v582_v36 = vlaneseq }
 0x194   :  { %1687 = vmatmul.mubr.msk.f32.vlgmr.msra.gmra.mxu0 %vm439_vm3, %v430_v29  ;;  %1699 = vmatprep.subr.mxu1 %v1855_v17 }
 0x195   :  { %v431_v39 = vmax.f32 %v1977_v37, 0.0 }
 0x197   :  { %1689 = vmatprep.mubr.msk.f32.mxu0 %vm439_vm3, %v431_v39 }
 0x198   :  { %1690 = vmatmul.mubr.msk.f32.gmra.mxu0 %vm439_vm3, %v432_v38 }
 0x199   :  { %1710 = vmatprep.mubr.msk.f32.mxu0 %vm1856_vm5, %v1855_v17 }
 0x254   :  { %v1688_v41 = vpop.f32.mrf.mxu0 }
 0x255   :  { %v524_v42 = vadd.f32 %v1688_v41, %v1584_v40 }
 0x256   :  { %v518_v43 = vpop.f32.mrf.mxu0 }
 0x257   :  { %1065 = vst.msk [vmem:[#allocation2 + $0x18] sm:$0xff] %vm537_vm4, %v524_v42  ;;  %v519_v44 = vadd.f32 %v1584_v40, %v518_v43  ;;  %v541_v46 = vsel %vm537_vm4, %v524_v42, -inf }
 0x258   :  { %v1691_v47 = vpop.f32.mrf.mxu0 }
 0x259   :  { %1064 = vst.msk [vmem:[#allocation2 + $0x10] sm:$0xff] %vm537_vm4, %v519_v44  ;;  %v538_v45 = vsel %vm537_vm4, %v519_v44, -inf  ;;  %v534_v48 = vadd.f32 %v1691_v47, %v1584_v40 }
 0x25a   :  { %539 = vmax.xlane.f32.xlu0 %v538_v45  ;;  %v528_v49 = vpop.f32.mrf.mxu0 }
 0x25b   :  { %1546 = vst.msk [vmem:[#allocation2 + $0x40] sm:$0xff] %vm537_vm4, %v534_v48  ;;  %v529_v50 = vadd.f32 %v1584_v40, %v528_v49  ;;  %v547_v62 = vsel %vm537_vm4, %v534_v48, -inf }
 0x25d   :  { %1545 = vst.msk [vmem:[#allocation2 + $0x38] sm:$0xff] %vm537_vm4, %v529_v50  ;;  %v544_v61 = vsel %vm537_vm4, %v529_v50, -inf }
 0x25e   :  { %542 = vmax.xlane.f32.xlu0 %v541_v46 }
 0x2e3   :  { %v540_v51 = vpop.xlane.xlu0 %539 }
 0x2e4   :  { %v550_v52 = vsub.f32 %v519_v44, %v540_v51  ;;  %v2061_v51 = vand.u32 127, %v582_v36 }
 0x2e6   :  { %v554_v53 = vmul.f32 1.442695, %v550_v52  ;;  %vm1066_vm14 = vcmp.eq.s32.totalorder %v2061_v51, 0 }
 0x2e7   :  { %v543_v54 = vpop.xlane.xlu0 %542 }
 0x2e8   :  { %1781 = vpow2.f32 %v554_v53  ;;  %v551_v55 = vsub.f32 %v524_v42, %v543_v54 }
 0x2ea   :  { %v556_v56 = vmul.f32 1.442695, %v551_v55 }
 0x2ec   :  { %1783 = vpow2.f32 %v556_v56 }
 0x2f5   :  { %v1782_v57 = vpop.eup %1781 }
 0x2f6   :  { %v562_v58 = vsel %vm537_vm4, %v1782_v57, 0.0 }
 0x2f7   :  { %563 = vadd.xlane.f32.xlu1 %v562_v58 }
 0x2f9   :  { %v1784_v59 = vpop.eup %1783 }
 0x2fa   :  { %v565_v60 = vsel %vm537_vm4, %v1784_v59, 0.0 }
 0x2fb   :  { %566 = vadd.xlane.f32.xlu1 %v565_v60 }
 0x2ff   :  { %545 = vmax.xlane.f32.xlu1 %v544_v61 }
 0x303   :  { %548 = vmax.xlane.f32.xlu1 %v547_v62 }
 0x380   :  { %v564_v63 = vpop.xlane.xlu1 %563 }
 0x381   :  { %1785 = vrcp.f32 %v564_v63 }
 0x384   :  { %v567_v0 = vpop.xlane.xlu1 %566 }
 0x385   :  { %1787 = vrcp.f32 %v567_v0 }
 0x388   :  { %v546_v1 = vpop.xlane.xlu1 %545 }
 0x389   :  { %v552_v3 = vsub.f32 %v529_v50, %v546_v1 }
 0x38b   :  { %v558_v4 = vmul.f32 1.442695, %v552_v3 }
 0x38c   :  { %v549_v7 = vpop.xlane.xlu1 %548 }
 0x38d   :  { %1789 = vpow2.f32 %v558_v4  ;;  %v553_v9 = vsub.f32 %v534_v48, %v549_v7 }
 0x38e   :  { %v1786_v10 = vpop.eup %1785 }
 0x38f   :  { %v560_v11 = vmul.f32 1.442695, %v553_v9  ;;  %v575_v12 = vmul.f32 %v1786_v10, %v1782_v57  ;;  %v1331_v57 = vsel %vm51_vm0, %v1927_v6, 0.0 }
 0x391   :  { %1791 = vpow2.f32 %v560_v11  ;;  %591 = vxpose.xlu0.b32.start [1/2] (short) (narrow) %v575_v12, 8  ;;  %v856_v22 = vmul.f32 %v575_v12, %v575_v12 }
 0x392   :  { %v1788_v13 = vpop.eup %1787 }
 0x393   :  { %v577_v14 = vmul.f32 %v1788_v13, %v1784_v59  ;;  %v858_v23 = vsel %vm537_vm4, %v856_v22, 0.0 }
 0x395   :  { %592 = vxpose.xlu0.b32.end [2/2] (short) (narrow) %v577_v14, 8  ;;  %1707 = vmatpush3.msra.mxu0 %v577_v14  ;;  %v857_v24 = vmul.f32 %v577_v14, %v577_v14 }
 0x396   :  { %1708 = vmatprep.subr.mxu0 %v1855_v17 }
 0x397   :  { %1709 = vmatpush3.msra.mxu0 %v575_v12  ;;  %v861_v25 = vsel %vm537_vm4, %v857_v24, 0.0 }
 0x398   :  { %1720 = vmatprep.subr.mxu0 %v1855_v17 }
 0x39a   :  { %v1790_v15 = vpop.eup %1789 }
 0x39b   :  { %v568_v16 = vsel %vm537_vm4, %v1790_v15, 0.0 }
 0x39c   :  { %569 = vadd.xlane.f32.xlu1 %v568_v16 }
 0x39e   :  { %v1792_v18 = vpop.eup %1791 }
 0x39f   :  { %v571_v19 = vsel %vm537_vm4, %v1792_v18, 0.0 }
 0x3a0   :  { %572 = vadd.xlane.f32.xlu1 %v571_v19 }
 0x3a4   :  { %851 = vadd.xlane.f32.xlu1 %v850_v20 }
 0x3a8   :  { %854 = vadd.xlane.f32.xlu1 %v853_v21 }
 0x3ac   :  { %859 = vadd.xlane.f32.xlu1 %v858_v23 }
 0x3b0   :  { %862 = vadd.xlane.f32.xlu1 %v861_v25 }
 0x40d   :  { %v607_v26 = vpop.trf.xlu0 }
 0x40e   :  { %1697 = vmatmul.mubr.msk.f32.vlgmr.msra.gmra.mxu1 %vm51_vm0, %v607_v26 }
 0x40f   :  { %1700 = vmatpush3.msra.mxu1 %v1922_v5  ;;  %1703 = vmatprep.mubr.msk.f32.mxu1 %vm1856_vm5, %v1855_v17 }
 0x410   :  { %1701 = vmatprep.subr.mxu1 %v1855_v17 }
 0x411   :  { %1702 = vmatpush3.msra.mxu1 %v1909_v2 }
 0x412   :  { %1713 = vmatprep.subr.mxu1 %v1855_v17  ;;  %1704 = vmatmul.mubr.msk.f32.vlgmr.msra.gmra.mxu1 %vm51_vm0, %v607_v26 }
 0x413   :  { %1714 = vmatpush3.msra.mxu1 %v577_v14  ;;  %1717 = vmatprep.mubr.msk.f32.mxu1 %vm1856_vm5, %v1855_v17 }
 0x414   :  { %1715 = vmatprep.subr.mxu1 %v1855_v17 }
 0x415   :  { %1716 = vmatpush3.msra.mxu1 %v575_v12 }
 0x416   :  { %1718 = vmatmul.mubr.msk.f32.vlgmr.msra.gmra.mxu1 %vm51_vm0, %v607_v26  ;;  %1727 = vmatprep.subr.mxu1 %v1855_v17 }
 0x417   :  { %1728 = vmatpush3.msra.mxu1 %v1935_v8  ;;  %1731 = vmatprep.mubr.msk.f32.mxu1 %vm1856_vm5, %v1855_v17 }
 0x418   :  { %1729 = vmatprep.subr.mxu1 %v1855_v17 }
 0x419   :  { %1730 = vmatpush3.msra.mxu1 %v1927_v6 }
 0x41a   :  { %1741 = vmatprep.subr.mxu1 %v1855_v17 }
 0x425   :  { %v570_v2 = vpop.xlane.xlu1 %569 }
 0x426   :  { %1793 = vrcp.f32 %v570_v2 }
 0x429   :  { %v573_v5 = vpop.xlane.xlu1 %572 }
 0x42a   :  { %1795 = vrcp.f32 %v573_v5 }
 0x42d   :  { %v852_v31 = vpop.xlane.xlu1 %851 }
 0x431   :  { %v855_v32 = vpop.xlane.xlu1 %854 }
 0x433   :  { %v1794_v27 = vpop.eup %1793 }
 0x434   :  { %v579_v28 = vmul.f32 %v1794_v27, %v1790_v15 }
 0x435   :  { %v860_v33 = vpop.xlane.xlu1 %859 }
 0x436   :  { %1072 = vxpose.xlu1.b32.start [1/2] (short) (narrow) %v579_v28, 8  ;;  %v864_v40 = vmul.f32 %v860_v33, %v852_v31  ;;  %v1337_v58 = vmul.f32 %v579_v28, %v579_v28 }
 0x437   :  { %v1796_v29 = vpop.eup %1795 }
 0x438   :  { %v581_v30 = vmul.f32 %v1796_v29, %v1792_v18  ;;  %v867_v42 = vsel %vm866_vm6, %v864_v40, 0.0  ;;  %v1339_v59 = vsel %vm537_vm4, %v1337_v58, 0.0 }
 0x439   :  { %v863_v34 = vpop.xlane.xlu1 %862 }
 0x43a   :  { %1073 = vxpose.xlu1.b32.end [2/2] (short) (narrow) %v581_v30, 8  ;;  %v865_v35 = vmul.f32 %v863_v34, %v855_v32  ;;  %v1338_v60 = vmul.f32 %v581_v30, %v581_v30 }
 0x43c   :  { %v868_v41 = vsel %vm866_vm6, %v865_v35, 0.0  ;;  %v1342_v61 = vsel %vm537_vm4, %v1338_v60, 0.0 }
 0x43d   :  { %v869_v43 = vadd.f32 %v868_v41, %v867_v42 }
 0x461   :  { %870 = vadd.xlane.f32.xlu1 %v869_v43 }
 0x4b2   :  { %v1088_v44 = vpop.trf.xlu1 }
 0x4b3   :  { %1732 = vmatmul.mubr.msk.f32.vlgmr.msra.gmra.mxu1 %vm51_vm0, %v1088_v44 }
 0x4b4   :  { %1742 = vmatpush3.msra.mxu1 %v581_v30  ;;  %1745 = vmatprep.mubr.msk.f32.mxu1 %vm1856_vm5, %v1855_v17 }
 0x4b5   :  { %1743 = vmatprep.subr.mxu1 %v1855_v17 }
 0x4b6   :  { %1744 = vmatpush3.msra.mxu1 %v579_v28 }
 0x4b7   :  { %1746 = vmatmul.mubr.msk.f32.vlgmr.msra.gmra.mxu1 %vm51_vm0, %v1088_v44 }
 0x4ce   :  { %v2042_v45 = vpop.f32.mrf.mxu1 }
 0x4d0   :  { %v1698_v46 = vpop.f32.mrf.mxu1 }
 0x4d2   :  { %v762_v47 = vpop.f32.mrf.mxu1 }
 0x4d3   :  { %1711 = vmatmul.mubr.msk.f32.vlgmr.msra.gmra.mxu0 %vm51_vm0, %v762_v47 }
 0x4d4   :  { %1721 = vmatpush3.msra.mxu0 %v432_v38  ;;  %v1705_v48 = vpop.f32.mrf.mxu1  ;;  %1724 = vmatprep.mubr.msk.f32.mxu0 %vm1856_vm5, %v1855_v17  ;;  %v2059_v38 = vshrl.u32 %v582_v36, 7 }
 0x4d5   :  { %1722 = vmatprep.subr.mxu0 %v1855_v17 }
 0x4d6   :  { %1723 = vmatpush3.msra.mxu0 %v431_v39  ;;  %v2052_v49 = vpop.f32.mrf.mxu1  ;;  %vm586_vm7 = vcmp.eq.s32.totalorder %v2059_v38, %v2061_v51 }
 0x4d7   :  { %1734 = vmatprep.subr.mxu0 %v1855_v17  ;;  %1725 = vmatmul.mubr.msk.f32.vlgmr.msra.gmra.mxu0 %vm51_vm0, %v1088_v44  ;;  %v2066_v37 = vsel %vm586_vm7, 1.0, %v1855_v17  ;;  %v954_v54 = vmul.f32 %v2052_v49, %v2052_v49 }
 0x4d8   :  { %1735 = vmatpush3.msra.mxu0 %v581_v30  ;;  %v1719_v50 = vpop.f32.mrf.mxu1  ;;  %1738 = vmatprep.mubr.msk.f32.mxu0 %vm1856_vm5, %v1855_v17  ;;  %v2094_v44 = vmul.f32 0.35355338, %v2066_v37 }
 0x4d9   :  { %1736 = vmatprep.subr.mxu0 %v1855_v17  ;;  %v955_v56 = vsel %vm537_vm4, %v954_v54, 0.0  ;;  %v1334_v17 = vsel %vm51_vm0, %v1935_v8, 0.0 }
 0x4da   :  { %1737 = vmatpush3.msra.mxu0 %v579_v28 }
 0x4ea   :  { %v871_v8 = vpop.xlane.xlu1 %870 }
 0x4eb   :  { %v872_v4 = vrot.slane %v871_v8, 4 }
 0x4ed   :  { %v873_v7 = vadd.f32 %v872_v4, %v871_v8 }
 0x4ef   :  { %v874_v9 = vrot.slane %v873_v7, 2 }
 0x4f1   :  { %v875_v13 = vadd.f32 %v874_v9, %v873_v7 }
 0x4f3   :  { %v876_v16 = vrot.slane %v875_v13, 1 }
 0x4f5   :  { %v877_v20 = vadd.f32 %v876_v16, %v875_v13 }
 0x573   :  { %v1243_v62 = vpop.f32.mrf.mxu1 }
 0x574   :  { %1739 = vmatmul.mubr.msk.f32.vlgmr.msra.gmra.mxu0 %vm51_vm0, %v1243_v62  ;;  %v1050_v62 = vsel %vm439_vm3, %v2042_v45, -inf }
 0x575   :  { %v1733_v63 = vpop.f32.mrf.mxu1 }
 0x577   :  { %v2085_v6 = vpop.f32.mrf.mxu1 }
 0x578   :  { %v1434_v58 = vmul.f32 %v2085_v6, %v2085_v6 }
 0x579   :  { %v1747_v3 = vpop.f32.mrf.mxu1 }
 0x57a   :  { %v1435_v60 = vsel %vm537_vm4, %v1434_v58, 0.0 }
 0x593   :  { %v2068_v39 = vpop.f32.mrf.mxu0 }
 0x594   :  { %v839_v52 = vmul.f32 %v2066_v37, %v2068_v39 }
 0x595   :  { %v1712_v53 = vpop.f32.mrf.mxu0 }
 0x596   :  { %v840_v55 = vsel %vm537_vm4, %v839_v52, 0.0 }
 0x597   :  { %841 = vadd.xlane.f32.xlu0 %v840_v55  ;;  %v2083_v0 = vpop.f32.mrf.mxu0 }
 0x599   :  { %v1726_v1 = vpop.f32.mrf.mxu0 }
 0x59b   :  { %956 = vadd.xlane.f32.xlu0 %v955_v56 }
 0x59f   :  { %1332 = vadd.xlane.f32.xlu0 %v1331_v57 }
 0x5a3   :  { %1335 = vadd.xlane.f32.xlu0 %v1334_v17 }
 0x5a7   :  { %1340 = vadd.xlane.f32.xlu0 %v1339_v59  ;;  %v589_v59 = vsub.f32 1.0, %v2066_v37 }
 0x5ab   :  { %1343 = vadd.xlane.f32.xlu0 %v1342_v61  ;;  %v2111_v61 = vmul.f32 %v2068_v39, %v589_v59 }
 0x5ad   :  { %v999_v63 = vsel %vm537_vm4, %v2111_v61, 0.0 }
 0x620   :  { %v842_v10 = vpop.xlane.xlu0 %841 }
 0x621   :  { %v843_v11 = vrot.slane %v842_v10, 4 }
 0x623   :  { %v844_v12 = vadd.f32 %v843_v11, %v842_v10 }
 0x624   :  { %v957_v21 = vpop.xlane.xlu0 %956 }
 0x625   :  { %v845_v14 = vrot.slane %v844_v12, 2  ;;  %v958_v22 = vrot.slane %v957_v21, 4 }
 0x627   :  { %v846_v15 = vadd.f32 %v845_v14, %v844_v12  ;;  %v959_v23 = vadd.f32 %v958_v22, %v957_v21 }
 0x628   :  { %v1333_v40 = vpop.xlane.xlu0 %1332 }
 0x629   :  { %v847_v18 = vrot.slane %v846_v15, 1  ;;  %v960_v25 = vrot.slane %v959_v23, 2 }
 0x62b   :  { %v848_v19 = vadd.f32 %v847_v18, %v846_v15  ;;  %v961_v26 = vadd.f32 %v960_v25, %v959_v23 }
 0x62c   :  { %v1336_v42 = vpop.xlane.xlu0 %1335 }
 0x62d   :  { %1748 = vpush %v848_v19  ;;  %v962_v2 = vrot.slane %v961_v26, 1 }
 0x62e   :  { %1750 = vpush %v877_v20 }
 0x62f   :  { %v963_v27 = vadd.f32 %v962_v2, %v961_v26 }
 0x630   :  { %v1341_v43 = vpop.xlane.xlu0 %1340 }
 0x631   :  { %v1345_v55 = vmul.f32 %v1341_v43, %v1333_v40 }
 0x633   :  { %v1347_v17 = vsel %vm866_vm6, %v1345_v55, 0.0 }
 0x634   :  { %v2089_v28 = vpop.f32.mrf.mxu0  ;;  %v1344_v50 = vpop.xlane.xlu0 %1343 }
 0x635   :  { %v1320_v36 = vmul.f32 %v2066_v37, %v2089_v28  ;;  %v1346_v53 = vmul.f32 %v1344_v50, %v1336_v42 }
 0x636   :  { %v1740_v29 = vpop.f32.mrf.mxu0 }
 0x637   :  { %v1321_v56 = vsel %vm537_vm4, %v1320_v36, 0.0  ;;  %v1348_v57 = vsel %vm866_vm6, %v1346_v53, 0.0 }
 0x65e   :  { %s2087_s6 = spop %1748 }
 0x65f   :  { %s1751_s27 = spop %1750 }
 0x660   :  { %v879_v24 = vstv %s1751_s27 }
 0x661   :  { %1797 = vrcp.f32 %v879_v24 }
 0x66e   :  { %v1798_v5 = vpop.eup %1797 }
 0x66f   :  { %1752 = vpush %v1798_v5 }
 0x670   :  { %1754 = vpush %v963_v27 }
 0x6a0   :  { %s2091_s28 = spop %1752 }
 0x6a1   :  { %s1755_s29 = spop %1754  ;;  %s882_s9 = smul.f32 %s2091_s28, %s2087_s6 }
 0x6a2   :  { %v965_v30 = vstv %s1755_s29 }
 0x6a3   :  { %1799 = vrsqrt.f32 %v965_v30  ;;  %vm968_vm8 = vcmp.eq.f32.partialorder %v965_v30, inf  ;;  %v971_v33 = vand.u32 2147483648, %v965_v30  ;;  %vm970_vm9 = vcmp.eq.f32.partialorder %v965_v30, 0.0  ;;  %s883_s10 = ssub.f32 0.0, %s882_s9 }
 0x6b0   :  { %v1800_v31 = vpop.eup %1799 }
 0x6b1   :  { %v967_v32 = vmul.f32 %v1800_v31, %v965_v30 }
 0x6b3   :  { %v969_v34 = vsel %vm968_vm8, %v965_v30, %v967_v32 }
 0x6b4   :  { %v972_v35 = vsel %vm970_vm9, %v971_v33, %v969_v34 }
 0x6b5   :  { %1756 = vpush %v972_v35 }
 0x6e6   :  { %s1757_s30 = spop %1756 }
 0x6e7   :  { %v974_v41 = vstv %s1757_s30 }
 0x6e8   :  { %1801 = vrcp.f32 %v974_v41 }
 0x6f5   :  { %v1802_v46 = vpop.eup %1801 }
 0x6f6   :  { %v976_v47 = vmul.f32 %v1802_v46, %v2052_v49  ;;  %v1349_v49 = vadd.f32 %v1348_v57, %v1347_v17  ;;  %v1067_v46 = vstv %s883_s10  ;;  %v1046_v57 = vsub.s32 0, %v2059_v38 }
 0x6f8   :  { %v977_v48 = vsub.f32 %v976_v47, %v2094_v44 }
 0x6fa   :  { %v978_v52 = vmul.f32 %v977_v48, %v977_v48 }
 0x6fc   :  { %v979_v54 = vsel %vm537_vm4, %v978_v52, 0.0 }
 0x6fd   :  { %980 = vadd.xlane.f32.xlu0 %v979_v54 }
 0x701   :  { %1322 = vadd.xlane.f32.xlu0 %v1321_v56 }
 0x705   :  { %1350 = vadd.xlane.f32.xlu0 %v1349_v49 }
 0x709   :  { %1436 = vadd.xlane.f32.xlu0 %v1435_v60 }
 0x70d   :  { %1051 = vmax.xlane.f32.xlu0 %v1050_v62 }
 0x711   :  { %1000 = vadd.xlane.f32.xlu0 %v999_v63 }
 0x786   :  { %v981_v1 = vpop.xlane.xlu0 %980 }
 0x787   :  { %v982_v3 = vrot.slane %v981_v1, 4 }
 0x789   :  { %v983_v8 = vadd.f32 %v982_v3, %v981_v1 }
 0x78a   :  { %v1323_v4 = vpop.xlane.xlu0 %1322 }
 0x78b   :  { %v984_v7 = vrot.slane %v983_v8, 2  ;;  %v1324_v22 = vrot.slane %v1323_v4, 4 }
 0x78d   :  { %v985_v9 = vadd.f32 %v984_v7, %v983_v8  ;;  %v1325_v25 = vadd.f32 %v1324_v22, %v1323_v4 }
 0x78e   :  { %v1351_v10 = vpop.xlane.xlu0 %1350 }
 0x78f   :  { %v986_v11 = vrot.slane %v985_v9, 1  ;;  %v1352_v23 = vrot.slane %v1351_v10, 4  ;;  %v1326_v2 = vrot.slane %v1325_v25, 2 }
 0x791   :  { %v987_v12 = vadd.f32 %v986_v11, %v985_v9  ;;  %v1353_v26 = vadd.f32 %v1352_v23, %v1351_v10  ;;  %v1327_v27 = vadd.f32 %v1326_v2, %v1325_v25 }
 0x792   :  { %v1437_v13 = vpop.xlane.xlu0 %1436 }
 0x793   :  { %1758 = vpush %v987_v12  ;;  %v1354_v5 = vrot.slane %v1353_v26, 2  ;;  %v1328_v31 = vrot.slane %v1327_v27, 1  ;;  %v1438_v43 = vrot.slane %v1437_v13, 4 }
 0x795   :  { %v1355_v29 = vadd.f32 %v1354_v5, %v1353_v26  ;;  %v1329_v41 = vadd.f32 %v1328_v31, %v1327_v27  ;;  %v1439_v47 = vadd.f32 %v1438_v43, %v1437_v13 }
 0x796   :  { %v2117_v39 = vpop.xlane.xlu0 %1051 }
 0x797   :  { %v1356_v33 = vrot.slane %v1355_v29, 1  ;;  %v1440_v52 = vrot.slane %v1439_v47, 2 }
 0x799   :  { %v1357_v42 = vadd.f32 %v1356_v33, %v1355_v29  ;;  %v1441_v53 = vadd.f32 %v1440_v52, %v1439_v47 }
 0x79a   :  { %v1001_v14 = vpop.xlane.xlu0 %1000 }
 0x79b   :  { %1803 = vrsqrt.f32 %v1001_v14  ;;  %vm1004_vm10 = vcmp.eq.f32.partialorder %v1001_v14, inf  ;;  %v1007_v18 = vand.u32 2147483648, %v1001_v14  ;;  %vm1006_vm11 = vcmp.eq.f32.partialorder %v1001_v14, 0.0 }
 0x79c   :  { %v1442_v54 = vrot.slane %v1441_v53, 1 }
 0x79e   :  { %v1443_v56 = vadd.f32 %v1442_v54, %v1441_v53 }
 0x7a8   :  { %v1804_v15 = vpop.eup %1803 }
 0x7a9   :  { %v1003_v16 = vmul.f32 %v1804_v15, %v1001_v14 }
 0x7ab   :  { %v1005_v19 = vsel %vm1004_vm10, %v1001_v14, %v1003_v16 }
 0x7ac   :  { %v1008_v20 = vsel %vm1006_vm11, %v1007_v18, %v1005_v19  ;;  %v2142_v18 = vmul.f32 %v2089_v28, %v589_v59  ;;  %v1530_v19 = vsel %vm439_vm3, %v2083_v0, -inf }
 0x7ad   :  { %v1009_v21 = vadd.f32 1e-15, %v1008_v20 }
 0x7af   :  { %1012 = vxpose.xlu0.b32.start.end [1/1] (short) (narrow) %v1009_v21, 8 }
 0x7c4   :  { %s1759_s8 = spop %1758 }
 0x7c5   :  { %v989_v24 = vstv %s1759_s8 }
 0x7c6   :  { %1805 = vrsqrt.f32 %v989_v24  ;;  %vm992_vm12 = vcmp.eq.f32.partialorder %v989_v24, inf  ;;  %v995_v34 = vand.u32 2147483648, %v989_v24  ;;  %vm994_vm13 = vcmp.eq.f32.partialorder %v989_v24, 0.0 }
 0x7d3   :  { %v1806_v30 = vpop.eup %1805 }
 0x7d4   :  { %v991_v32 = vmul.f32 %v1806_v30, %v989_v24 }
 0x7d6   :  { %v993_v35 = vsel %vm992_vm12, %v989_v24, %v991_v32 }
 0x7d7   :  { %v996_v40 = vsel %vm994_vm13, %v995_v34, %v993_v35 }
 0x7d8   :  { %1760 = vpush %v996_v40 }
 0x7d9   :  { %1762 = vpush %v1329_v41 }
 0x7da   :  { %1764 = vpush %v1357_v42 }
 0x809   :  { %s1761_s11 = spop %1760 }
 0x80a   :  { %v1068_v48 = vstv %s1761_s11  ;;  %s2122_s12 = spop %1762 }
 0x80b   :  { %v1069_v50 = vsel %vm1066_vm14, %v1067_v46, %v1068_v48  ;;  %s1765_s13 = spop %1764 }
 0x80c   :  { %1071 = vst.msk [vmem:[#allocation2 + $0x20] sm:$0x1] %vm1070_vm15, %v1069_v50  ;;  %v1359_v36 = vstv %s1765_s13 }
 0x80d   :  { %1807 = vrcp.f32 %v1359_v36 }
 0x80e   :  { %1809 = vrcp.f32 %v1009_v21 }
 0x81a   :  { %v1808_v55 = vpop.eup %1807 }
 0x81b   :  { %1766 = vpush %v1808_v55  ;;  %v1810_v58 = vpop.eup %1809 }
 0x81c   :  { %1768 = vpush %v1443_v56  ;;  %v1011_v60 = vmul.f32 %v1810_v58, %v2111_v61  ;;  %v1053_v61 = vsub.f32 %v2042_v45, %v2117_v39  ;;  %v1479_v45 = vsel %vm537_vm4, %v2142_v18, 0.0 }
 0x81e   :  { %v1054_v11 = vmul.f32 1.442695, %v1053_v61 }
 0x82b   :  { %v1028_v17 = vpop.trf.xlu0 }
 0x82c   :  { %v1047_v49 = vrot.slane %v1028_v17, %v1046_v57 }
 0x82e   :  { %1811 = vrcp.f32 %v1047_v49 }
 0x83b   :  { %v1812_v62 = vpop.eup %1811 }
 0x83c   :  { %v1049_v63 = vmul.f32 %v1812_v62, %v1011_v60 }
 0x83e   :  { %1063 = vst.msk [vmem:[#allocation2 + $0x8] sm:$0xff] %vm537_vm4, %v1049_v63 }
 0x84c   :  { %s2132_s14 = spop %1766 }
 0x84d   :  { %s1769_s15 = spop %1768  ;;  %s1362_s17 = smul.f32 %s2132_s14, %s2122_s12 }
 0x84e   :  { %v1445_v1 = vstv %s1769_s15 }
 0x84f   :  { %1813 = vrsqrt.f32 %v1445_v1  ;;  %vm1448_vm0 = vcmp.eq.f32.partialorder %v1445_v1, inf  ;;  %v1451_v4 = vand.u32 2147483648, %v1445_v1  ;;  %vm1450_vm1 = vcmp.eq.f32.partialorder %v1445_v1, 0.0  ;;  %s1363_s2 = ssub.f32 0.0, %s1362_s17 }
 0x851   :  { %v1547_v50 = vstv %s1363_s2 }
 0x85c   :  { %v1814_v3 = vpop.eup %1813 }
 0x85d   :  { %v1447_v8 = vmul.f32 %v1814_v3, %v1445_v1 }
 0x85f   :  { %v1449_v7 = vsel %vm1448_vm0, %v1445_v1, %v1447_v8 }
 0x860   :  { %v1452_v9 = vsel %vm1450_vm1, %v1451_v4, %v1449_v7 }
 0x861   :  { %1770 = vpush %v1452_v9 }
 0x892   :  { %s1771_s16 = spop %1770 }
 0x893   :  { %v1454_v10 = vstv %s1771_s16 }
 0x894   :  { %1815 = vrcp.f32 %v1454_v10 }
 0x895   :  { %1817 = vpow2.f32 %v1054_v11 }
 0x8a1   :  { %v1816_v12 = vpop.eup %1815 }
 0x8a2   :  { %v1456_v13 = vmul.f32 %v1816_v12, %v2085_v6  ;;  %v1818_v6 = vpop.eup %1817 }
 0x8a4   :  { %v1457_v14 = vsub.f32 %v1456_v13, %v2094_v44  ;;  %v1056_v44 = vsel %vm439_vm3, %v1818_v6, 0.0 }
 0x8a6   :  { %v1458_v15 = vmul.f32 %v1457_v14, %v1457_v14 }
 0x8a8   :  { %v1459_v16 = vsel %vm537_vm4, %v1458_v15, 0.0 }
 0x8a9   :  { %1460 = vadd.xlane.f32.xlu1 %v1459_v16 }
 0x8ad   :  { %1531 = vmax.xlane.f32.xlu1 %v1530_v19 }
 0x8b1   :  { %1480 = vadd.xlane.f32.xlu1 %v1479_v45 }
 0x8b5   :  { %1057 = vadd.xlane.f32.xlu1 %v1056_v44 }
 0x932   :  { %v1461_v39 = vpop.xlane.xlu1 %1460 }
 0x933   :  { %v1462_v20 = vrot.slane %v1461_v39, 4 }
 0x935   :  { %v1463_v21 = vadd.f32 %v1462_v20, %v1461_v39 }
 0x936   :  { %v1532_v22 = vpop.xlane.xlu1 %1531 }
 0x937   :  { %v1464_v37 = vrot.slane %v1463_v21, 2  ;;  %v1533_v28 = vsub.f32 %v2083_v0, %v1532_v22 }
 0x939   :  { %v1534_v59 = vmul.f32 1.442695, %v1533_v28  ;;  %v1465_v23 = vadd.f32 %v1464_v37, %v1463_v21 }
 0x93a   :  { %v1481_v24 = vpop.xlane.xlu1 %1480 }
 0x93b   :  { %1819 = vpow2.f32 %v1534_v59  ;;  %v1466_v25 = vrot.slane %v1465_v23, 1  ;;  %vm1484_vm2 = vcmp.eq.f32.partialorder %v1481_v24, inf  ;;  %v1487_v35 = vand.u32 2147483648, %v1481_v24 }
 0x93c   :  { %vm1486_vm5 = vcmp.eq.f32.partialorder %v1481_v24, 0.0 }
 0x93d   :  { %v1467_v26 = vadd.f32 %v1466_v25, %v1465_v23 }
 0x93e   :  { %v1058_v2 = vpop.xlane.xlu1 %1057 }
 0x93f   :  { %1821 = vlog2.f32 %v1058_v2  ;;  %1772 = vpush %v1467_v26 }
 0x940   :  { %1823 = vrsqrt.f32 %v1481_v24 }
 0x948   :  { %v1820_v5 = vpop.eup %1819 }
 0x949   :  { %v1536_v27 = vsel %vm439_vm3, %v1820_v5, 0.0 }
 0x94a   :  { %1537 = vadd.xlane.f32.xlu1 %v1536_v27 }
 0x94c   :  { %v1822_v29 = vpop.eup %1821 }
 0x94d   :  { %v1060_v30 = vmul.f32 0.6931472, %v1822_v29  ;;  %v1824_v0 = vpop.eup %1823 }
 0x94e   :  { %v1483_v33 = vmul.f32 %v1824_v0, %v1481_v24 }
 0x94f   :  { %v1061_v31 = vsub.f32 %v1053_v61, %v1060_v30 }
 0x950   :  { %v1485_v34 = vsel %vm1484_vm2, %v1481_v24, %v1483_v33 }
 0x951   :  { %1062 = vst.msk [vmem:[#allocation2] sm:$0xff] %vm439_vm3, %v1061_v31  ;;  %v1488_v40 = vsel %vm1486_vm5, %v1487_v35, %v1485_v34 }
 0x952   :  { %v1489_v41 = vadd.f32 1e-15, %v1488_v40 }
 0x970   :  { %s1773_s0 = spop %1772 }
 0x971   :  { %v1469_v32 = vstv %s1773_s0 }
 0x972   :  { %1825 = vrsqrt.f32 %v1469_v32  ;;  %vm1472_vm6 = vcmp.eq.f32.partialorder %v1469_v32, inf  ;;  %v1475_v46 = vand.u32 2147483648, %v1469_v32  ;;  %vm1474_vm7 = vcmp.eq.f32.partialorder %v1469_v32, 0.0 }
 0x97d   :  { %1492 = vxpose.xlu1.b32.start.end [1/1] (short) (narrow) %v1489_v41, 8 }
 0x97f   :  { %v1826_v42 = vpop.eup %1825 }
 0x980   :  { %v1471_v43 = vmul.f32 %v1826_v42, %v1469_v32 }
 0x982   :  { %v1473_v47 = vsel %vm1472_vm6, %v1469_v32, %v1471_v43 }
 0x983   :  { %v1476_v48 = vsel %vm1474_vm7, %v1475_v46, %v1473_v47 }
 0x984   :  { %1774 = vpush %v1476_v48 }
 0x9b5   :  { %s1775_s18 = spop %1774 }
 0x9b6   :  { %v1548_v36 = vstv %s1775_s18 }
 0x9b7   :  { %v1549_v52 = vsel %vm1066_vm14, %v1547_v50, %v1548_v36 }
 0x9b8   :  { %1550 = vst.msk [vmem:[#allocation2 + $0x48] sm:$0x1] %vm1070_vm15, %v1549_v52 }
 0x9d3   :  { %v1538_v53 = vpop.xlane.xlu1 %1537 }
 0x9d4   :  { %1827 = vlog2.f32 %v1538_v53 }
 0x9d5   :  { %1829 = vrcp.f32 %v1489_v41 }
 0x9e1   :  { %v1828_v54 = vpop.eup %1827 }
 0x9e2   :  { %v1540_v55 = vmul.f32 0.6931472, %v1828_v54  ;;  %v1830_v58 = vpop.eup %1829 }
 0x9e3   :  { %v1491_v51 = vmul.f32 %v1830_v58, %v2142_v18 }
 0x9e4   :  { %v1541_v56 = vsub.f32 %v1533_v28, %v1540_v55 }
 0x9e6   :  { %1543 = vst.msk [vmem:[#allocation2 + $0x28] sm:$0xff] %vm439_vm3, %v1541_v56 }
 0x9f9   :  { %v1508_v17 = vpop.trf.xlu1 }
 0x9fa   :  { %v1527_v49 = vrot.slane %v1508_v17, %v1046_v57 }
 0x9fc   :  { %1831 = vrcp.f32 %v1527_v49 }
 0xa09   :  { %v1832_v60 = vpop.eup %1831 }
 0xa0a   :  { %v1529_v62 = vmul.f32 %v1832_v60, %v1491_v51 }
 0xa0c   :  { %1544 = vst.msk [vmem:[#allocation2 + $0x30] sm:$0xff] %vm537_vm4, %v1529_v62 }
 0xa0d   :  { %1844 = shalt.err (!%p1841_p4)
}
 0xa0e   :  { %s1858_s20 = smov 128   ;;  %s1859_s21 = smov 8  }
 0xa0f   :  { %1562 = dma.vmem_to_hbm [thread:$0]  %s1557_s19, 1280, %s2172_s7, [#allocation3], %s1858_s20, %s1858_s20, %s1859_s21  }
 0xa10   :  { %1853 = dma.done.wait [#allocation3], 1280  }
 0xa11   :  { %1854 = vsyncadd [#allocation3], 4294966016 }
 0xa12   :  { %1566 = vsyncpa [#allocation3], 1 }

</bundles_post_ra>
